<compile_context>
chip_gen: v7x
topology: tpu7x:2x2x1
jax: 0.10.0
libtpu: 0.0.40
codegen_flags: <defaults>
</compile_context>

<pallas_src>
import functools

import jax
import jax.numpy as jnp
from jax.experimental import pallas as pl
from jax.experimental.pallas import tpu as pltpu

_LANE = 128


# ----------------------------- helpers ------------------------------------
def _sublane_multiple(dtype):
    # (8, 128) min tile for 32-bit, (16, 128) for bf16, (32, 128) for 8-bit.
    return max(8, 32 // jnp.dtype(dtype).itemsize)


def _round_up(x, m):
    return ((x + m - 1) // m) * m


def _round_down(x, m):
    return (x // m) * m


def _vmem_capacity_bytes():
    try:
        return int(pltpu.get_tpu_info().vmem_capacity_bytes)
    except Exception:
        return 64 << 20  # conservative: v7x per-TensorCore VMEM


def _single_pass_footprint(tb, n, itemsize):
    # in + out blocks, double-buffered (4 * io) plus ~3 tile-sized f32
    # temporaries created inside the body (f32 cast, x*x, centered x).
    return tb * n * (4 * itemsize + 3 * 4)


def _pick_row_tile(batch, n, dtype, target_block_bytes, vmem_budget):
    itemsize = jnp.dtype(dtype).itemsize
    sub = _sublane_multiple(dtype)
    rows = max(sub, _round_down(target_block_bytes // max(1, n * itemsize), sub))
    # Never allocate (much) more rows than the array has.
    rows = min(rows, _round_up(batch, sub))
    # Keep >=2 grid steps when the batch allows it (v7x megacore, pipelining).
    if batch > sub:
        rows = min(rows, max(sub, _round_up((batch + 1) // 2, sub)))
    # Shrink until the whole per-step VMEM footprint fits the budget.
    while rows > sub and _single_pass_footprint(rows, n, itemsize) > vmem_budget:
        rows -= sub
    return int(rows)


# --------------------------- single-pass path ------------------------------
def _layernorm_kernel(x_ref, o_ref, *, eps):
    # x_ref / o_ref: (tb, n) with n the full (flattened) reduction width.
    x = x_ref[...].astype(jnp.float32)
    inv_n = jnp.float32(1.0 / x.shape[-1])
    s1 = jnp.sum(x, axis=-1, keepdims=True)
    s2 = jnp.sum(x * x, axis=-1, keepdims=True)
    mean = s1 * inv_n
    var = s2 * inv_n - mean * mean
    inv = jax.lax.rsqrt(var + jnp.float32(eps))          # per-row, EUP
    o_ref[...] = ((x - mean) * inv).astype(o_ref.dtype)  # 1 mul/elem


def _layer_norm_single_pass(x2d, eps, tb, vmem_cap):
    batch, n = x2d.shape
    itemsize = x2d.dtype.itemsize
    grid = (pl.cdiv(batch, tb),)

    vmem_limit = int(min(
        max(_single_pass_footprint(tb, n, itemsize) + (4 << 20), 16 << 20),
        int(0.9 * vmem_cap)))

    cost = pl.CostEstimate(
        flops=5 * batch * n,                               # x*x, 2 sums, sub, mul
        transcendentals=batch,                             # one rsqrt per row
        bytes_accessed=2 * batch * n * itemsize)           # read x + write out

    return pl.pallas_call(
        functools.partial(_layernorm_kernel, eps=eps),
        out_shape=jax.ShapeDtypeStruct((batch, n), x2d.dtype),
        grid=grid,
        in_specs=[pl.BlockSpec((tb, n), lambda i: (i, 0))],
        out_specs=pl.BlockSpec((tb, n), lambda i: (i, 0)),
        compiler_params=pltpu.CompilerParams(
            dimension_semantics=("parallel",),
            vmem_limit_bytes=vmem_limit),
        cost_estimate=cost,
    )(x2d)


# ------------------- two-pass fallback for very large rows -----------------
def _stats_kernel(x_ref, mean_ref, inv_ref, s1_ref, s2_ref, *, eps, n_total, tc):
    j = pl.program_id(1)

    @pl.when(j == 0)
    def _():
        s1_ref[...] = jnp.zeros_like(s1_ref)
        s2_ref[...] = jnp.zeros_like(s2_ref)

    x = x_ref[...].astype(jnp.float32)
    if n_total % tc != 0:
        # Mask out-of-range columns in the ragged last chunk.
        col = j * tc + jax.lax.broadcasted_iota(jnp.int32, x.shape, 1)
        x = jnp.where(col < n_total, x, 0.0)
    s1_ref[...] += jnp.sum(x, axis=-1, keepdims=True)
    s2_ref[...] += jnp.sum(x * x, axis=-1, keepdims=True)

    @pl.when(j == pl.num_programs(1) - 1)
    def _():
        inv_n = jnp.float32(1.0 / n_total)
        mean = s1_ref[...] * inv_n
        var = s2_ref[...] * inv_n - mean * mean
        mean_ref[...] = mean
        inv_ref[...] = jax.lax.rsqrt(var + jnp.float32(eps))


def _normalize_kernel(x_ref, mean_ref, inv_ref, o_ref):
    x = x_ref[...].astype(jnp.float32)
    o_ref[...] = ((x - mean_ref[...]) * inv_ref[...]).astype(o_ref.dtype)


def _layer_norm_two_pass(x2d, eps, tb, target_block_bytes, vmem_cap):
    batch, n = x2d.shape
    itemsize = x2d.dtype.itemsize

    tc = max(_LANE, _round_down(target_block_bytes // max(1, tb * itemsize), _LANE))
    tc = min(tc, _round_up(n, _LANE))
    grid = (pl.cdiv(batch, tb), pl.cdiv(n, tc))

    footprint = tb * tc * (2 * itemsize + 2 * 4) + 8 * tb * 4
    vmem_limit = int(min(max(footprint + (4 << 20), 16 << 20), int(0.9 * vmem_cap)))
    params = pltpu.CompilerParams(
        dimension_semantics=("parallel", "arbitrary"),
        vmem_limit_bytes=vmem_limit)

    mean, inv = pl.pallas_call(
        functools.partial(_stats_kernel, eps=eps, n_total=n, tc=tc),
        out_shape=(jax.ShapeDtypeStruct((batch, 1), jnp.float32),
                   jax.ShapeDtypeStruct((batch, 1), jnp.float32)),
        grid=grid,
        in_specs=[pl.BlockSpec((tb, tc), lambda i, j: (i, j))],
        out_specs=(pl.BlockSpec((tb, 1), lambda i, j: (i, 0)),
                   pl.BlockSpec((tb, 1), lambda i, j: (i, 0))),
        scratch_shapes=[pltpu.VMEM((tb, 1), jnp.float32),
                        pltpu.VMEM((tb, 1), jnp.float32)],
        compiler_params=params,
    )(x2d)

    out2d = pl.pallas_call(
        _normalize_kernel,
        out_shape=jax.ShapeDtypeStruct((batch, n), x2d.dtype),
        grid=grid,
        in_specs=[pl.BlockSpec((tb, tc), lambda i, j: (i, j)),
                  pl.BlockSpec((tb, 1), lambda i, j: (i, 0)),
                  pl.BlockSpec((tb, 1), lambda i, j: (i, 0))],
        out_specs=pl.BlockSpec((tb, tc), lambda i, j: (i, j)),
        compiler_params=pltpu.CompilerParams(
            dimension_semantics=("parallel", "parallel"),
            vmem_limit_bytes=vmem_limit),
    )(x2d, mean, inv)
    return out2d


# ------------------------------- wrapper ------------------------------------
def layer_norm(x, *, eps=1e-5):
    """x: (batch, seq, d_model) -> same shape, normalized over dims (1, 2)."""
    orig_shape = x.shape
    batch = orig_shape[0]
    n = 1
    for d in orig_shape[1:]:
        n *= d
    x2d = x.reshape(batch, n)

    vmem_cap = _vmem_capacity_bytes()
    # ~8 MiB blocks when VMEM is 128 MiB (v5e/v6e), ~2 MiB on 64 MiB (v7x).
    target_block_bytes = (8 << 20) if vmem_cap >= (96 << 20) else (2 << 20)
    vmem_budget = int(0.45 * vmem_cap)

    itemsize = x2d.dtype.itemsize
    sub = _sublane_multiple(x.dtype)

    if _single_pass_footprint(sub, n, itemsize) <= vmem_budget:
        tb = _pick_row_tile(batch, n, x.dtype, target_block_bytes, vmem_budget)
        out2d = _layer_norm_single_pass(x2d, eps, tb, vmem_cap)
    else:
        # Rows too large for a single VMEM block: two-pass (stats + normalize).
        out2d = _layer_norm_two_pass(x2d, eps, sub, target_block_bytes, vmem_cap)

    return out2d.reshape(orig_shape)


if __name__ == "__main__":
    # Small shapes consistent with the module: LayerNorm(d_model=512).
    batch, seq, d_model = 2, 8, 512
    eps = 1e-5

    key = jax.random.PRNGKey(0)
    x = jax.random.normal(key, (batch, seq, d_model), dtype=jnp.float32)

    out = layer_norm(x, eps=eps)
    out = jax.block_until_ready(out)

    # Pure-JAX reference with the exact same math as the PyTorch module.
    mean = jnp.mean(x, axis=(1, 2), keepdims=True)
    mean_x2 = jnp.mean(x * x, axis=(1, 2), keepdims=True)
    var = mean_x2 - mean ** 2
    ref = (x - mean) / jnp.sqrt(var + eps)

    assert out.shape == (batch, seq, d_model)
    assert jnp.allclose(out, ref, atol=2e-5, rtol=2e-5), "mismatch vs reference"

    # Also exercise the two-pass (huge seq*d_model) fallback on a small shape,
    # with a chunk width that does not divide n so the ragged-column mask path
    # is covered.
    x2d = x.reshape(batch, seq * d_model)
    out2 = _layer_norm_two_pass(
        x2d, eps, tb=8,
        target_block_bytes=1536 * 8 * x.dtype.itemsize,   # -> tc=1536, 4096%1536!=0
        vmem_cap=64 << 20)
    out2 = jax.block_until_ready(out2)
    assert jnp.allclose(out2.reshape(x.shape), ref, atol=2e-5, rtol=2e-5), \
        "two-pass path mismatch vs reference"

    print("KERNEL_OK")
</pallas_src>

<mosaic_0001>
module attributes {stable_mosaic.version = 11 : i64} {
  func.func @_layernorm_kernel(%arg0: i32, %arg1: memref<8x4096xf32, #tpu.memory_space<vmem>>, %arg2: memref<8x4096xf32, #tpu.memory_space<vmem>>) attributes {dimension_semantics = [#tpu.dimension_semantics<parallel>], iteration_bounds = array<i64: 1>, scalar_prefetch = 0 : i64, scratch_operands = 0 : i64, tpu.core_type = #tpu.core_type<tc>, window_params = [{transform_indices = @transform_0, window_bounds = array<i64: 8, 4096>}, {transform_indices = @transform_1, window_bounds = array<i64: 8, 4096>}]} {
    %c0 = arith.constant 0 : index
    %c0_0 = arith.constant 0 : index
    %0 = vector.load %arg1[%c0, %c0_0] : memref<8x4096xf32, #tpu.memory_space<vmem>>, vector<8x4096xf32>
    %cst = arith.constant dense<0.000000e+00> : vector<8xf32>
    %1 = vector.multi_reduction <add>, %0, %cst [1] : vector<8x4096xf32> to vector<8xf32>
    %2 = vector.shape_cast %1 : vector<8xf32> to vector<8x1xf32>
    %3 = arith.mulf %0, %0 : vector<8x4096xf32>
    %cst_1 = arith.constant dense<0.000000e+00> : vector<8xf32>
    %4 = vector.multi_reduction <add>, %3, %cst_1 [1] : vector<8x4096xf32> to vector<8xf32>
    %5 = vector.shape_cast %4 : vector<8xf32> to vector<8x1xf32>
    %cst_2 = arith.constant 2.44140625E-4 : f32
    %6 = vector.broadcast %cst_2 : f32 to vector<8x1xf32>
    %7 = arith.mulf %2, %6 : vector<8x1xf32>
    %cst_3 = arith.constant 2.44140625E-4 : f32
    %8 = vector.broadcast %cst_3 : f32 to vector<8x1xf32>
    %9 = arith.mulf %5, %8 : vector<8x1xf32>
    %10 = arith.mulf %7, %7 : vector<8x1xf32>
    %11 = arith.subf %9, %10 : vector<8x1xf32>
    %cst_4 = arith.constant 9.99999974E-6 : f32
    %12 = vector.broadcast %cst_4 : f32 to vector<8x1xf32>
    %13 = arith.addf %11, %12 : vector<8x1xf32>
    %14 = math.rsqrt %13 : vector<8x1xf32>
    %15 = vector.broadcast %7 : vector<8x1xf32> to vector<8x4096xf32>
    %16 = arith.subf %0, %15 : vector<8x4096xf32>
    %17 = vector.broadcast %14 : vector<8x1xf32> to vector<8x4096xf32>
    %18 = arith.mulf %16, %17 : vector<8x4096xf32>
    %c0_5 = arith.constant 0 : index
    %c0_6 = arith.constant 0 : index
    %19 = vector.load %arg2[%c0_5, %c0_6] : memref<8x4096xf32, #tpu.memory_space<vmem>>, vector<8x4096xf32>
    tpu.vector_store %arg2[%c0_5, %c0_6], %18 {strides = array<i32>} : memref<8x4096xf32, #tpu.memory_space<vmem>>, vector<8x4096xf32>,
    return
  }
  func.func @transform_0(%arg0: i32) -> (i32, i32) {
    %c0_i32 = arith.constant 0 : i32
    %c0_i32_0 = arith.constant 0 : i32
    return %arg0, %c0_i32 : i32, i32
  }
  func.func @transform_1(%arg0: i32) -> (i32, i32) {
    %c0_i32 = arith.constant 0 : i32
    %c0_i32_0 = arith.constant 0 : i32
    return %arg0, %c0_i32 : i32, i32
  }
}

</mosaic_0001>

<bundles_post_ra>
// kernel: tpu_custom_call.1
= control target key start
LH: loop header
LB: loop body
LE: loop exit
PB: predicated region body
PF: predicated region fallthrough
CT: control target
= control target key end

     0   :  { %6 = vsyncpa [#allocation3], 0  ;;  %s1503_s0 = inlined_call_operand.hbm [shape: f32[2,4096], index: 0, kind: input, shape index: {}]   ;;  %s1504_s1 = inlined_call_operand.hbm [shape: f32[2,4096], index: 1, kind: output, shape index: {}]  }
   0x1   :  { %7 = vsyncpa [#allocation4], 0 }
   0x2   :  { %12 = vsyncadd [#allocation3], 3072  ;;  %s1101_s6 = smov [#allocation2]   ;;  %s1053_s10 = scalar_lea.hbm %s1503_s0, 1024 }
   0x3   :  { %s13_s7 = sshll.u32 %s1101_s6, 4  ;;  %p1054_p0 = scmp.ne.s32.totalorder %s1503_s0, %s1053_s10  ;;  %s14_s7 = int_to_ptr.vmem [resolvable:$true] %s13_s7 }
   0x4   :  { %p1057_p1 = scmp.lt.u32.totalorder %s1053_s10, %s1503_s0 }
   0x6   :  { %p1059_p2 = pnand %p1057_p1, %p1054_p0 }
   0x8   :  { %1062 = shalt.err (!%p1059_p2)
}
   0x9   :  { %s1063_s15 = scalar_lea.vmem %s14_s7, 1024  ;;  %s1067_s16 = scalar_lea.vmem %s14_s7, 4096 }
   0xa   :  { %p1064_p3 = scmp.ne.s32.totalorder %s14_s7, %s1063_s15  ;;  %p1068_p4 = scmp.lt.s32.totalorder %s14_s7, %s14_s7 }
   0xb   :  { %p1069_p5 = scmp.lt.s32.totalorder %s1067_s16, %s1063_s15 }
   0xd   :  { %p1070_p6 = por %p1069_p5, %p1068_p4 }
   0xf   :  { %p1071_p7 = pnand %p1070_p6, %p1064_p3 }
  0x11   :  { %1074 = shalt.err (!%p1071_p7)
}
  0x12   :  { %s1102_s17 = smov 1024   ;;  %s1103_s18 = smov 64  }
  0x13   :  { %19 = dma.hbm_to_vmem [thread:$0]  %s1503_s0, 1024, %s14_s7, [#allocation3], %s1102_s17, %s1102_s17, %s1103_s18  }
  0x14   :  { %1097 = dma.done.wait [#allocation3], 4096  }
  0x15   :  { %1098 = vsyncadd [#allocation3], 4294963200  ;;  %v1104_v0 = vmov 1983009808   ;;  %v94_v2 = vlaneseq  ;;  %v1135_v3 = vld [vmem:[#allocation2] sm:$0xff]  ;;  %v1152_v12 = vld [vmem:[#allocation2 + $0x8] sm:$0xff] }
  0x16   :  { %v92_v1 = vunpack.c.l.s4 %v1104_v0  ;;  %v1139_v6 = vld [vmem:[#allocation2 + $0x40] sm:$0xff]  ;;  %v1158_v15 = vld [vmem:[#allocation2 + $0x48] sm:$0xff]  ;;  %v1174_v27 = vld [vmem:[#allocation2 + $0x10] sm:$0xff] }
  0x17   :  { %v1137_v5 = vshrl.u32 %v94_v2, 7  ;;  %1515 = vst [vmem:[#allocation8_spill] sm:$0xff] %v1139_v6  ;;  %v1141_v7 = vld [vmem:[#allocation2 + $0x80] sm:$0xff]  ;;  %v87_v9 = vcombine.low %v1135_v3, %v1139_v6  ;;  %v88_v13 = vcombine.high %v1135_v3, %v1139_v6  ;;  %1518 = vst [vmem:[#allocation11_spill] sm:$0xff] %v1158_v15  ;;  %v1160_v16 = vld [vmem:[#allocation2 + $0x88] sm:$0xff]  ;;  %v123_v22 = vcombine.low %v1152_v12, %v1158_v15 }
  0x18   :  { %v93_v4 = vunpack.c.0.s8 %v92_v1  ;;  %1516 = vst [vmem:[#allocation9_spill] sm:$0xff] %v1141_v7  ;;  %v1143_v8 = vld [vmem:[#allocation2 + $0xc0] sm:$0xff]  ;;  %1519 = vst [vmem:[#allocation12_spill] sm:$0xff] %v1160_v16  ;;  %v1162_v17 = vld [vmem:[#allocation2 + $0xc8] sm:$0xff]  ;;  %v124_v26 = vcombine.high %v1152_v12, %v1158_v15 }
  0x19   :  { %1517 = vst [vmem:[#allocation10_spill] sm:$0xff] %v1143_v8  ;;  %v89_v10 = vcombine.low %v1141_v7, %v1143_v8  ;;  %v90_v14 = vcombine.high %v1141_v7, %v1143_v8  ;;  %1520 = vst [vmem:[#allocation13_spill] sm:$0xff] %v1162_v17  ;;  %v125_v23 = vcombine.low %v1160_v16, %v1162_v17  ;;  %v1176_v28 = vld [vmem:[#allocation2 + $0x50] sm:$0xff]  ;;  %v1195_v47 = vld [vmem:[#allocation2 + $0x18] sm:$0xff] }
  0x1a   :  { %v1150_v11 = vsub.s32 %v93_v4, %v1137_v5  ;;  %v126_v30 = vcombine.high %v1160_v16, %v1162_v17  ;;  %v1182_v33 = vld [vmem:[#allocation2 + $0x90] sm:$0xff]  ;;  %v159_v38 = vcombine.low %v1174_v27, %v1176_v28  ;;  %v160_v45 = vcombine.high %v1174_v27, %v1176_v28  ;;  %v1197_v48 = vld [vmem:[#allocation2 + $0x58] sm:$0xff]  ;;  %v1216_v4 = vld [vmem:[#allocation2 + $0x20] sm:$0xff] }
  0x1b   :  { %1521 = vst [vmem:[#allocation14_spill] sm:$0xff] %v1182_v33  ;;  %v1184_v34 = vld [vmem:[#allocation2 + $0xd0] sm:$0xff]  ;;  %v1202_v53 = vld [vmem:[#allocation2 + $0x98] sm:$0xff]  ;;  %v195_v58 = vcombine.low %v1195_v47, %v1197_v48  ;;  %v196_v0 = vcombine.high %v1195_v47, %v1197_v48 }
  0x1c   :  { %v97_v18 = vrot.slane %v87_v9, %v1150_v11  ;;  %v111_v19 = vrot.slane %v89_v10, %v1150_v11  ;;  %v104_v20 = vrot.slane %v88_v13, %v1150_v11  ;;  %v118_v21 = vrot.slane %v90_v14, %v1150_v11  ;;  %1522 = vst [vmem:[#allocation15_spill] sm:$0xff] %v1184_v34  ;;  %v1204_v54 = vld [vmem:[#allocation2 + $0xd8] sm:$0xff] }
  0x1d   :  { %v133_v31 = vrot.slane %v123_v22, %v1150_v11  ;;  %v147_v32 = vrot.slane %v125_v23, %v1150_v11  ;;  %v140_v37 = vrot.slane %v124_v26, %v1150_v11  ;;  %v154_v39 = vrot.slane %v126_v30, %v1150_v11  ;;  %1523 = vst [vmem:[#allocation16_spill] sm:$0xff] %v1202_v53 }
  0x1e   :  { %v119_v24 = vcombine.low %v97_v18, %v111_v19  ;;  %v120_v25 = vcombine.high %v97_v18, %v111_v19  ;;  %v121_v29 = vcombine.low %v104_v20, %v118_v21  ;;  %v122_v36 = vcombine.high %v104_v20, %v118_v21  ;;  %1524 = vst [vmem:[#allocation17_spill] sm:$0xff] %v1204_v54  ;;  %v1220_v18 = vld [vmem:[#allocation2 + $0x60] sm:$0xff] }
  0x1f   :  { %v155_v40 = vcombine.low %v133_v31, %v147_v32  ;;  %v161_v41 = vcombine.low %v1182_v33, %v1184_v34  ;;  %v156_v43 = vcombine.high %v133_v31, %v147_v32  ;;  %v169_v46 = vrot.slane %v159_v38, %v1150_v11  ;;  %v1222_v19 = vld [vmem:[#allocation2 + $0xa0] sm:$0xff]  ;;  %v1245_v32 = vld [vmem:[#allocation2 + $0x30] sm:$0xff] }
  0x20   :  { %v407_v35 = vadd.f32 %v120_v25, %v119_v24  ;;  %v157_v49 = vcombine.low %v140_v37, %v154_v39  ;;  %v162_v50 = vcombine.high %v1182_v33, %v1184_v34  ;;  %v158_v55 = vcombine.high %v140_v37, %v154_v39  ;;  %v1224_v20 = vld [vmem:[#allocation2 + $0xe0] sm:$0xff]  ;;  %v1236_v24 = vld [vmem:[#allocation2 + $0x28] sm:$0xff] }
  0x21   :  { %v183_v51 = vrot.slane %v161_v41, %v1150_v11  ;;  %v176_v57 = vrot.slane %v160_v45, %v1150_v11  ;;  %v197_v61 = vcombine.low %v1202_v53, %v1204_v54  ;;  %v198_v2 = vcombine.high %v1202_v53, %v1204_v54  ;;  %v1238_v25 = vld [vmem:[#allocation2 + $0x68] sm:$0xff] }
  0x22   :  { %v408_v42 = vadd.f32 %v407_v35, %v121_v29  ;;  %v190_v59 = vrot.slane %v162_v50, %v1150_v11  ;;  %v205_v10 = vrot.slane %v195_v58, %v1150_v11  ;;  %v440_v21 = vmul.f32 %v1135_v3, %v1135_v3  ;;  %v1247_v35 = vld [vmem:[#allocation2 + $0x70] sm:$0xff] }
  0x23   :  { %v191_v60 = vcombine.low %v169_v46, %v183_v51  ;;  %v192_v63 = vcombine.high %v169_v46, %v183_v51  ;;  %v219_v13 = vrot.slane %v197_v61, %v1150_v11  ;;  %v1230_v22 = vmul.f32 %v1152_v12, %v1152_v12 }
  0x24   :  { %v409_v44 = vadd.f32 %v408_v42, %v122_v36  ;;  %v193_v9 = vcombine.low %v176_v57, %v190_v59  ;;  %v1234_v23 = vmul.f32 %v1174_v27, %v1174_v27  ;;  %v194_v26 = vcombine.high %v176_v57, %v190_v59  ;;  %v1276_v57 = vld [vmem:[#allocation2 + $0xe8] sm:$0xff] }
  0x25   :  { %v212_v29 = vrot.slane %v196_v0, %v1150_v11  ;;  %v1243_v31 = vmul.f32 %v1195_v47, %v1195_v47  ;;  %v226_v36 = vrot.slane %v198_v2, %v1150_v11  ;;  %v448_v37 = vmul.f32 %v1139_v6, %v1139_v6 }
  0x26   :  { %v410_v52 = vadd.f32 %v409_v44, %v155_v40  ;;  %v456_v38 = vmul.f32 %v1141_v7, %v1141_v7  ;;  %v464_v39 = vmul.f32 %v1143_v8, %v1143_v8  ;;  %v227_v40 = vcombine.low %v205_v10, %v219_v13 }
  0x27   :  { %v231_v41 = vcombine.low %v1216_v4, %v1220_v18  ;;  %v233_v42 = vcombine.low %v1222_v19, %v1224_v20  ;;  %v232_v44 = vcombine.high %v1216_v4, %v1220_v18  ;;  %v267_v45 = vcombine.low %v1236_v24, %v1238_v25 }
  0x28   :  { %v411_v56 = vadd.f32 %v410_v52, %v156_v43  ;;  %v268_v46 = vcombine.high %v1236_v24, %v1238_v25  ;;  %v228_v50 = vcombine.high %v205_v10, %v219_v13  ;;  %v303_v51 = vcombine.low %v1245_v32, %v1247_v35 }
  0x29   :  { %v304_v52 = vcombine.high %v1245_v32, %v1247_v35  ;;  %v229_v58 = vcombine.low %v212_v29, %v226_v36  ;;  %v230_v59 = vcombine.high %v212_v29, %v226_v36  ;;  %v506_v61 = vcombine.low %v456_v38, %v464_v39 }
  0x2a   :  { %v412_v62 = vadd.f32 %v411_v56, %v157_v49  ;;  %v1268_v49 = vmul.f32 %v1216_v4, %v1216_v4  ;;  %v1274_v56 = vld [vmem:[#allocation2 + $0xa8] sm:$0xff]  ;;  %v255_v0 = vrot.slane %v233_v42, %v1150_v11  ;;  %v248_v2 = vrot.slane %v232_v44, %v1150_v11 }
  0x2b   :  { %v457_v10 = vmul.f32 %v1160_v16, %v1160_v16  ;;  %v465_v13 = vmul.f32 %v1162_v17, %v1162_v17  ;;  %v269_v29 = vcombine.low %v1274_v56, %v1276_v57  ;;  %v505_v36 = vcombine.high %v440_v21, %v448_v37 }
  0x2c   :  { %v413_v1 = vadd.f32 %v412_v62, %v158_v55  ;;  %v234_v62 = vcombine.high %v1222_v19, %v1224_v20  ;;  %v1298_v42 = vrot.slane %v267_v45, %v1150_v11  ;;  %v528_v44 = vrot.slane %v506_v61, %v1150_v11 }
  0x2d   :  { %v1304_v8 = vrot.slane %v268_v46, %v1150_v11  ;;  %v450_v6 = vmul.f32 %v1176_v28, %v1176_v28 }
  0x2e   :  { %v414_v14 = vadd.f32 %v413_v1, %v191_v60  ;;  %v504_v60 = vcombine.low %v440_v21, %v448_v37 }
  0x30   :  { %v415_v30 = vadd.f32 %v414_v14, %v192_v63  ;;  %v241_v63 = vrot.slane %v231_v41, %v1150_v11  ;;  %v1289_v14 = vld [vmem:[#allocation2 + $0xb0] sm:$0xff]  ;;  %v270_v41 = vcombine.high %v1274_v56, %v1276_v57 }
  0x32   :  { %v416_v43 = vadd.f32 %v415_v30, %v193_v9  ;;  %v449_v9 = vmul.f32 %v1158_v15, %v1158_v15  ;;  %v263_v17 = vcombine.low %v241_v63, %v255_v0  ;;  %v264_v45 = vcombine.high %v241_v63, %v255_v0 }
  0x33   :  { %v1315_v46 = vrot.slane %v270_v41, %v1150_v11 }
  0x34   :  { %v417_v55 = vadd.f32 %v416_v43, %v194_v26  ;;  %v1291_v26 = vld [vmem:[#allocation2 + $0xf0] sm:$0xff]  ;;  %v514_v43 = vrot.slane %v504_v60, %v1150_v11  ;;  %v521_v60 = vrot.slane %v505_v36, %v1150_v11  ;;  %v541_v63 = vcombine.high %v1230_v22, %v449_v9 }
  0x35   :  { %v305_v21 = vcombine.low %v1289_v14, %v1291_v26  ;;  %v306_v37 = vcombine.high %v1289_v14, %v1291_v26 }
  0x36   :  { %v418_v1 = vadd.f32 %v417_v55, %v227_v40  ;;  %v507_v40 = vcombine.high %v456_v38, %v464_v39  ;;  %v262_v55 = vrot.slane %v234_v62, %v1150_v11  ;;  %v540_v38 = vcombine.low %v1230_v22, %v449_v9 }
  0x37   :  { %v542_v39 = vcombine.low %v457_v10, %v465_v13  ;;  %v291_v62 = vrot.slane %v269_v29, %v1150_v11  ;;  %v458_v29 = vmul.f32 %v1182_v33, %v1182_v33  ;;  %v1331_v22 = vrot.slane %v304_v52, %v1150_v11 }
  0x38   :  { %v419_v30 = vadd.f32 %v418_v1, %v228_v50  ;;  %v535_v61 = vrot.slane %v507_v40, %v1150_v11  ;;  %v537_v1 = vcombine.high %v514_v43, %v528_v44  ;;  %v266_v7 = vcombine.high %v248_v2, %v262_v55 }
  0x39   :  { %v564_v0 = vrot.slane %v542_v39, %v1150_v11  ;;  %v466_v40 = vmul.f32 %v1184_v34, %v1184_v34 }
  0x3a   :  { %v420_v16 = vadd.f32 %v419_v30, %v229_v58  ;;  %v536_v58 = vcombine.low %v514_v43, %v528_v44  ;;  %v265_v30 = vcombine.low %v248_v2, %v262_v55  ;;  %v538_v41 = vcombine.low %v521_v60, %v535_v61 }
  0x3b   :  { %v1328_v2 = vrot.slane %v303_v51, %v1150_v11  ;;  %v301_v43 = vcombine.low %v1304_v8, %v1315_v46  ;;  %v539_v55 = vcombine.high %v521_v60, %v535_v61  ;;  %v557_v51 = vrot.slane %v541_v63, %v1150_v11  ;;  %v1351_v61 = vld [vmem:[#allocation2 + $0xb8] sm:$0xff] }
  0x3c   :  { %v421_v50 = vadd.f32 %v420_v16, %v230_v59  ;;  %v543_v16 = vcombine.high %v457_v10, %v465_v13  ;;  %v550_v59 = vrot.slane %v540_v38, %v1150_v11  ;;  %v824_v9 = vadd.f32 %v537_v1, %v536_v58  ;;  %v1333_v10 = vld [vmem:[#allocation2 + $0x38] sm:$0xff] }
  0x3d   :  { %v1335_v13 = vld [vmem:[#allocation2 + $0x78] sm:$0xff]  ;;  %v302_v38 = vcombine.high %v1304_v8, %v1315_v46  ;;  %v578_v58 = vcombine.low %v458_v29, %v466_v40  ;;  %v451_v8 = vmul.f32 %v1197_v48, %v1197_v48 }
  0x3e   :  { %v422_v15 = vadd.f32 %v421_v50, %v263_v17  ;;  %v299_v17 = vcombine.low %v1298_v42, %v291_v62  ;;  %v571_v52 = vrot.slane %v543_v16, %v1150_v11  ;;  %v572_v39 = vcombine.low %v550_v59, %v564_v0  ;;  %v1353_v46 = vld [vmem:[#allocation2 + $0xf8] sm:$0xff] }
  0x3f   :  { %v576_v50 = vcombine.low %v1234_v23, %v450_v6  ;;  %v825_v1 = vadd.f32 %v824_v9, %v538_v41  ;;  %v339_v60 = vcombine.low %v1333_v10, %v1335_v13  ;;  %v573_v63 = vcombine.high %v550_v59, %v564_v0 }
  0x40   :  { %v423_v36 = vadd.f32 %v422_v15, %v264_v45  ;;  %v300_v15 = vcombine.high %v1298_v42, %v291_v62  ;;  %v327_v42 = vrot.slane %v305_v21, %v1150_v11  ;;  %v334_v62 = vrot.slane %v306_v37, %v1150_v11 }
  0x41   :  { %v826_v16 = vadd.f32 %v825_v1, %v539_v55  ;;  %v467_v21 = vmul.f32 %v1204_v54, %v1204_v54  ;;  %v574_v37 = vcombine.low %v557_v51, %v571_v52  ;;  %v579_v41 = vcombine.high %v458_v29, %v466_v40 }
  0x42   :  { %v424_v44 = vadd.f32 %v423_v36, %v265_v30  ;;  %v577_v36 = vcombine.high %v1234_v23, %v450_v6  ;;  %v600_v34 = vrot.slane %v578_v58, %v1150_v11  ;;  %v341_v59 = vcombine.low %v1351_v61, %v1353_v46 }
  0x43   :  { %v827_v33 = vadd.f32 %v826_v16, %v572_v39  ;;  %v342_v0 = vcombine.high %v1351_v61, %v1353_v46  ;;  %v336_v6 = vcombine.high %v1328_v2, %v327_v42  ;;  %v575_v29 = vcombine.high %v557_v51, %v571_v52 }
  0x44   :  { %v425_v45 = vadd.f32 %v424_v44, %v266_v7  ;;  %v459_v7 = vmul.f32 %v1202_v53, %v1202_v53  ;;  %v586_v44 = vrot.slane %v576_v50, %v1150_v11  ;;  %v593_v55 = vrot.slane %v577_v36, %v1150_v11 }
  0x45   :  { %v828_v40 = vadd.f32 %v827_v33, %v573_v63  ;;  %v607_v39 = vrot.slane %v579_v41, %v1150_v11  ;;  %v612_v50 = vcombine.low %v1243_v31, %v451_v8  ;;  %v338_v54 = vcombine.high %v1331_v22, %v334_v62 }
  0x46   :  { %v426_v30 = vadd.f32 %v425_v45, %v299_v17  ;;  %v335_v17 = vcombine.low %v1328_v2, %v327_v42  ;;  %v340_v45 = vcombine.high %v1333_v10, %v1335_v13  ;;  %v608_v1 = vcombine.low %v586_v44, %v600_v34 }
  0x47   :  { %v829_v16 = vadd.f32 %v828_v40, %v574_v37  ;;  %v349_v53 = vrot.slane %v339_v60, %v1150_v11  ;;  %v363_v2 = vrot.slane %v341_v59, %v1150_v11  ;;  %v452_v33 = vmul.f32 %v1220_v18, %v1220_v18 }
  0x48   :  { %v427_v9 = vadd.f32 %v426_v30, %v300_v15  ;;  %v337_v15 = vcombine.low %v1331_v22, %v334_v62  ;;  %v614_v30 = vcombine.low %v459_v7, %v467_v21  ;;  %v460_v51 = vmul.f32 %v1222_v19, %v1222_v19 }
  0x49   :  { %v609_v52 = vcombine.high %v586_v44, %v600_v34  ;;  %v830_v42 = vadd.f32 %v829_v16, %v575_v29  ;;  %v613_v63 = vcombine.high %v1243_v31, %v451_v8  ;;  %v615_v37 = vcombine.high %v459_v7, %v467_v21 }
  0x4a   :  { %v428_v23 = vadd.f32 %v427_v9, %v301_v43  ;;  %v622_v22 = vrot.slane %v612_v50, %v1150_v11  ;;  %v610_v60 = vcombine.low %v593_v55, %v607_v39  ;;  %v636_v36 = vrot.slane %v614_v30, %v1150_v11 }
  0x4b   :  { %v831_v41 = vadd.f32 %v830_v42, %v608_v1  ;;  %v356_v9 = vrot.slane %v340_v45, %v1150_v11  ;;  %v371_v59 = vcombine.low %v349_v53, %v363_v2  ;;  %v611_v44 = vcombine.high %v593_v55, %v607_v39 }
  0x4c   :  { %v429_v58 = vadd.f32 %v428_v23, %v302_v38  ;;  %v468_v38 = vmul.f32 %v1224_v20, %v1224_v20  ;;  %v372_v29 = vcombine.high %v349_v53, %v363_v2  ;;  %v629_v40 = vrot.slane %v613_v63, %v1150_v11 }
  0x4d   :  { %v832_v23 = vadd.f32 %v831_v41, %v609_v52  ;;  %v643_v31 = vrot.slane %v615_v37, %v1150_v11  ;;  %v648_v8 = vcombine.low %v1268_v49, %v452_v33  ;;  %v644_v21 = vcombine.low %v622_v22, %v636_v36 }
  0x4e   :  { %v430_v43 = vadd.f32 %v429_v58, %v335_v17  ;;  %v370_v17 = vrot.slane %v342_v0, %v1150_v11  ;;  %v445_v45 = vmul.f32 %v1236_v24, %v1236_v24  ;;  %v453_v0 = vmul.f32 %v1238_v25, %v1238_v25 }
  0x4f   :  { %v833_v50 = vadd.f32 %v832_v23, %v610_v60  ;;  %v461_v53 = vmul.f32 %v1274_v56, %v1274_v56  ;;  %v645_v55 = vcombine.high %v622_v22, %v636_v36  ;;  %v646_v30 = vcombine.low %v629_v40, %v643_v31 }
  0x50   :  { %v431_v62 = vadd.f32 %v430_v43, %v336_v6  ;;  %v650_v6 = vcombine.low %v460_v51, %v468_v38  ;;  %v373_v58 = vcombine.low %v356_v9, %v370_v17  ;;  %v374_v1 = vcombine.high %v356_v9, %v370_v17 }
  0x51   :  { %v834_v39 = vadd.f32 %v833_v50, %v611_v44  ;;  %v649_v16 = vcombine.high %v1268_v49, %v452_v33  ;;  %v651_v2 = vcombine.high %v460_v51, %v468_v38  ;;  %v658_v52 = vrot.slane %v648_v8, %v1150_v11 }
  0x52   :  { %v432_v34 = vadd.f32 %v431_v62, %v337_v15  ;;  %v672_v42 = vrot.slane %v650_v6, %v1150_v11  ;;  %v647_v62 = vcombine.high %v629_v40, %v643_v31  ;;  %v684_v36 = vcombine.low %v445_v45, %v453_v0 }
  0x53   :  { %v835_v63 = vadd.f32 %v834_v39, %v644_v21  ;;  %v665_v41 = vrot.slane %v649_v16, %v1150_v11  ;;  %v679_v22 = vrot.slane %v651_v2, %v1150_v11  ;;  %v446_v49 = vmul.f32 %v1245_v32, %v1245_v32 }
  0x54   :  { %v433_v7 = vadd.f32 %v432_v34, %v338_v54  ;;  %v469_v54 = vmul.f32 %v1276_v57, %v1276_v57  ;;  %v680_v17 = vcombine.low %v658_v52, %v672_v42  ;;  %v454_v33 = vmul.f32 %v1247_v35, %v1247_v35 }
  0x55   :  { %v836_v60 = vadd.f32 %v835_v63, %v645_v55  ;;  %v681_v51 = vcombine.high %v658_v52, %v672_v42  ;;  %v462_v44 = vmul.f32 %v1289_v14, %v1289_v14  ;;  %v470_v23 = vmul.f32 %v1291_v26, %v1291_v26 }
  0x56   :  { %v434_v15 = vadd.f32 %v433_v7, %v371_v59  ;;  %v686_v59 = vcombine.low %v461_v53, %v469_v54  ;;  %v687_v40 = vcombine.high %v461_v53, %v469_v54  ;;  %v682_v31 = vcombine.low %v665_v41, %v679_v22 }
  0x57   :  { %v837_v34 = vadd.f32 %v836_v60, %v646_v30  ;;  %v694_v8 = vrot.slane %v684_v36, %v1150_v11  ;;  %v683_v6 = vcombine.high %v665_v41, %v679_v22  ;;  %v720_v55 = vcombine.low %v446_v49, %v454_v33 }
  0x58   :  { %v435_v43 = vadd.f32 %v434_v15, %v372_v29  ;;  %v685_v29 = vcombine.high %v445_v45, %v453_v0  ;;  %v708_v7 = vrot.slane %v686_v59, %v1150_v11  ;;  %v722_v39 = vcombine.low %v462_v44, %v470_v23 }
  0x59   :  { %v838_v38 = vadd.f32 %v837_v34, %v647_v62  ;;  %v447_v45 = vmul.f32 %v1333_v10, %v1333_v10  ;;  %v455_v0 = vmul.f32 %v1335_v13, %v1335_v13  ;;  %v463_v16 = vmul.f32 %v1351_v61, %v1351_v61 }
  0x5a   :  { %v436_v37 = vadd.f32 %v435_v43, %v373_v58  ;;  %v701_v58 = vrot.slane %v685_v29, %v1150_v11  ;;  %v716_v15 = vcombine.low %v694_v8, %v708_v7  ;;  %v717_v53 = vcombine.high %v694_v8, %v708_v7 }
  0x5b   :  { %v839_v21 = vadd.f32 %v838_v38, %v680_v17  ;;  %v471_v2 = vmul.f32 %v1353_v46, %v1353_v46  ;;  %v721_v43 = vcombine.high %v446_v49, %v454_v33  ;;  %v723_v52 = vcombine.high %v462_v44, %v470_v23 }
  0x5c   :  { %v437_v9 = vadd.f32 %v436_v37, %v374_v1  ;;  %v715_v1 = vrot.slane %v687_v40, %v1150_v11  ;;  %v730_v63 = vrot.slane %v720_v55, %v1150_v11  ;;  %v744_v37 = vrot.slane %v722_v39, %v1150_v11 }
  0x5d   :  { %v840_v50 = vadd.f32 %v839_v21, %v681_v51  ;;  %v737_v22 = vrot.slane %v721_v43, %v1150_v11  ;;  %v751_v36 = vrot.slane %v723_v52, %v1150_v11  ;;  %v756_v17 = vcombine.low %v447_v45, %v455_v0 }
  0x5e   :  { %438 = vadd.xlane.f32.xlu0 %v437_v9  ;;  %v718_v42 = vcombine.low %v701_v58, %v715_v1  ;;  %v719_v60 = vcombine.high %v701_v58, %v715_v1  ;;  %v752_v9 = vcombine.low %v730_v63, %v744_v37  ;;  %v758_v59 = vcombine.low %v463_v16, %v471_v2 }
  0x5f   :  { %v841_v30 = vadd.f32 %v840_v50, %v682_v31  ;;  %v753_v51 = vcombine.high %v730_v63, %v744_v37  ;;  %v757_v49 = vcombine.high %v447_v45, %v455_v0  ;;  %v759_v33 = vcombine.high %v463_v16, %v471_v2 }
  0x60   :  { %v754_v44 = vcombine.low %v737_v22, %v751_v36  ;;  %v766_v23 = vrot.slane %v756_v17, %v1150_v11  ;;  %v780_v29 = vrot.slane %v758_v59, %v1150_v11  ;;  %v755_v31 = vcombine.high %v737_v22, %v751_v36 }
  0x61   :  { %v842_v54 = vadd.f32 %v841_v30, %v683_v6  ;;  %v773_v7 = vrot.slane %v757_v49, %v1150_v11  ;;  %v787_v21 = vrot.slane %v759_v33, %v1150_v11  ;;  %v1106_v43 = vmov 842150450  }
  0x62   :  { %v788_v6 = vcombine.low %v766_v23, %v780_v29  ;;  %v789_v58 = vcombine.high %v766_v23, %v780_v29  ;;  %v872_v52 = vunpack.c.l.s4 %v1106_v43  ;;  %v1108_v11 = vmov 1987475062   ;;  %v1532_v43 = vld [vmem:[#allocation13_spill] sm:$0xff] }
  0x63   :  { %v843_v62 = vadd.f32 %v842_v54, %v716_v15  ;;  %v790_v15 = vcombine.low %v773_v7, %v787_v21  ;;  %v791_v39 = vcombine.high %v773_v7, %v787_v21  ;;  %v1105_v54 = vmov 269488144  }
  0x64   :  { %v865_v16 = vunpack.c.l.s4 %v1105_v54  ;;  %v886_v37 = vunpack.c.l.s4 %v1108_v11  ;;  %v873_v36 = vunpack.c.0.s8 %v872_v52 }
  0x65   :  { %v844_v41 = vadd.f32 %v843_v62, %v717_v53 }
  0x66   :  { %v866_v62 = vunpack.c.0.s8 %v865_v16  ;;  %v887_v17 = vunpack.c.0.s8 %v886_v37  ;;  %v1531_v16 = vld [vmem:[#allocation10_spill] sm:$0xff] }
  0x67   :  { %v845_v34 = vadd.f32 %v844_v41, %v718_v42  ;;  %v1107_v42 = vmov 1414812756  }
  0x68   :  { %v879_v63 = vunpack.c.l.s4 %v1107_v42  ;;  %v890_v33 = vsub.s32 %v887_v17, %v1137_v5  ;;  %v1533_v42 = vld [vmem:[#allocation15_spill] sm:$0xff] }
  0x69   :  { %v846_v38 = vadd.f32 %v845_v34, %v719_v60  ;;  %v869_v34 = vsub.s32 %v866_v62, %v1137_v5 }
  0x6b   :  { %v847_v40 = vadd.f32 %v846_v38, %v752_v9  ;;  %v880_v9 = vunpack.c.0.s8 %v879_v63  ;;  %v876_v38 = vsub.s32 %v873_v36, %v1137_v5 }
  0x6d   :  { %v848_v8 = vadd.f32 %v847_v40, %v753_v51  ;;  %v883_v49 = vsub.s32 %v880_v9, %v1137_v5 }
  0x6f   :  { %v849_v50 = vadd.f32 %v848_v8, %v754_v44 }
  0x71   :  { %v850_v1 = vadd.f32 %v849_v50, %v755_v31 }
  0x73   :  { %v851_v55 = vadd.f32 %v850_v1, %v788_v6  ;;  %v1525_v1 = vld [vmem:[#allocation8_spill] sm:$0xff] }
  0x75   :  { %v852_v30 = vadd.f32 %v851_v55, %v789_v58  ;;  %v1526_v55 = vld [vmem:[#allocation11_spill] sm:$0xff] }
  0x77   :  { %v853_v45 = vadd.f32 %v852_v30, %v790_v15 }
  0x79   :  { %v854_v0 = vadd.f32 %v853_v45, %v791_v39 }
  0x7b   :  { %855 = vadd.xlane.f32.xlu0 %v854_v0  ;;  %v1529_v0 = vld [vmem:[#allocation14_spill] sm:$0xff] }
  0xeb   :  { %v439_v53 = vpop.xlane.xlu0 %438 }
  0xec   :  { %v857_v2 = vmul.f32 0.00024414063, %v439_v53 }
  0xee   :  { %v859_v22 = vmul.f32 %v857_v2, %v857_v2  ;;  %v870_v44 = vrot.slane %v857_v2, %v869_v34  ;;  %v877_v23 = vrot.slane %v857_v2, %v876_v38  ;;  %v1436_v29 = vrot.slane %v857_v2, %v883_v49 }
  0xef   :  { %v1438_v40 = vrot.slane %v857_v2, %v890_v33 }
  0xf0   :  { %v896_v31 = vsub.f32 %v1135_v3, %v870_v44  ;;  %v897_v8 = vsub.f32 %v1152_v12, %v870_v44  ;;  %v898_v7 = vsub.f32 %v1174_v27, %v870_v44  ;;  %v899_v21 = vsub.f32 %v1195_v47, %v870_v44 }
  0xf1   :  { %v900_v6 = vsub.f32 %v1216_v4, %v870_v44  ;;  %v901_v50 = vsub.f32 %v1236_v24, %v870_v44  ;;  %v902_v5 = vsub.f32 %v1245_v32, %v870_v44  ;;  %v903_v58 = vsub.f32 %v1333_v10, %v870_v44  ;;  %v1527_v32 = vld [vmem:[#allocation9_spill] sm:$0xff]  ;;  %v1528_v10 = vld [vmem:[#allocation12_spill] sm:$0xff] }
  0xf2   :  { %v904_v15 = vsub.f32 %v1525_v1, %v877_v23  ;;  %v905_v39 = vsub.f32 %v1526_v55, %v877_v23  ;;  %v906_v3 = vsub.f32 %v1176_v28, %v877_v23  ;;  %v907_v12 = vsub.f32 %v1197_v48, %v877_v23  ;;  %v1530_v28 = vld [vmem:[#allocation16_spill] sm:$0xff] }
  0xf3   :  { %v908_v27 = vsub.f32 %v1220_v18, %v877_v23  ;;  %v909_v47 = vsub.f32 %v1238_v25, %v877_v23  ;;  %v910_v4 = vsub.f32 %v1247_v35, %v877_v23  ;;  %v911_v24 = vsub.f32 %v1335_v13, %v877_v23 }
  0xf4   :  { %v912_v30 = vsub.f32 %v1527_v32, %v1436_v29  ;;  %v913_v45 = vsub.f32 %v1528_v10, %v1436_v29  ;;  %v914_v53 = vsub.f32 %v1529_v0, %v1436_v29  ;;  %v915_v48 = vsub.f32 %v1530_v28, %v1436_v29 }
  0xf5   :  { %v916_v18 = vsub.f32 %v1222_v19, %v1436_v29  ;;  %v917_v25 = vsub.f32 %v1274_v56, %v1436_v29  ;;  %v918_v35 = vsub.f32 %v1289_v14, %v1436_v29  ;;  %v919_v13 = vsub.f32 %v1351_v61, %v1436_v29  ;;  %v1534_v19 = vld [vmem:[#allocation17_spill] sm:$0xff] }
  0xf6   :  { %v920_v2 = vsub.f32 %v1531_v16, %v1438_v40  ;;  %v921_v52 = vsub.f32 %v1532_v43, %v1438_v40  ;;  %v922_v63 = vsub.f32 %v1533_v42, %v1438_v40  ;;  %v923_v11 = vsub.f32 %v1534_v19, %v1438_v40 }
  0xf7   :  { %v924_v56 = vsub.f32 %v1224_v20, %v1438_v40  ;;  %v925_v14 = vsub.f32 %v1276_v57, %v1438_v40  ;;  %v926_v62 = vsub.f32 %v1291_v26, %v1438_v40 }
 0x108   :  { %v856_v60 = vpop.xlane.xlu0 %855 }
 0x109   :  { %v858_v41 = vmul.f32 0.00024414063, %v856_v60  ;;  %v927_v60 = vsub.f32 %v1353_v46, %v1438_v40 }
 0x10b   :  { %v860_v59 = vsub.f32 %v858_v41, %v859_v22 }
 0x10d   :  { %v861_v51 = vadd.f32 1e-05, %v860_v59 }
 0x10f   :  { %1051 = vrsqrt.f32 %v861_v51 }
 0x119   :  { %v1052_v54 = vpop.eup %1051 }
 0x11a   :  { %v935_v61 = vrot.slane %v1052_v54, %v869_v34  ;;  %v942_v37 = vrot.slane %v1052_v54, %v876_v38  ;;  %v949_v41 = vrot.slane %v1052_v54, %v883_v49  ;;  %v956_v22 = vrot.slane %v1052_v54, %v890_v33 }
 0x11c   :  { %v961_v36 = vmul.f32 %v935_v61, %v896_v31  ;;  %v962_v9 = vmul.f32 %v935_v61, %v897_v8  ;;  %v963_v17 = vmul.f32 %v935_v61, %v898_v7  ;;  %v964_v59 = vmul.f32 %v935_v61, %v899_v21 }
 0x11d   :  { %v965_v51 = vmul.f32 %v935_v61, %v900_v6  ;;  %v966_v44 = vmul.f32 %v935_v61, %v901_v50  ;;  %v967_v20 = vmul.f32 %v935_v61, %v902_v5  ;;  %v968_v23 = vmul.f32 %v935_v61, %v903_v58 }
 0x11e   :  { %v969_v29 = vmul.f32 %v942_v37, %v904_v15  ;;  %v970_v57 = vmul.f32 %v942_v37, %v905_v39  ;;  %v971_v34 = vmul.f32 %v942_v37, %v906_v3  ;;  %v972_v38 = vmul.f32 %v942_v37, %v907_v12  ;;  %993 = vst [vmem:[#allocation5] sm:$0xff] %v961_v36 }
 0x11f   :  { %994 = vst [vmem:[#allocation5 + $0x8] sm:$0xff] %v962_v9  ;;  %995 = vst [vmem:[#allocation5 + $0x10] sm:$0xff] %v963_v17  ;;  %v973_v26 = vmul.f32 %v942_v37, %v908_v27  ;;  %v974_v46 = vmul.f32 %v942_v37, %v909_v47  ;;  %v975_v49 = vmul.f32 %v942_v37, %v910_v4 }
 0x120   :  { %996 = vst [vmem:[#allocation5 + $0x18] sm:$0xff] %v964_v59  ;;  %v976_v33 = vmul.f32 %v942_v37, %v911_v24  ;;  %997 = vst [vmem:[#allocation5 + $0x20] sm:$0xff] %v965_v51  ;;  %v977_v40 = vmul.f32 %v949_v41, %v912_v30  ;;  %v978_v31 = vmul.f32 %v949_v41, %v913_v45 }
 0x121   :  { %998 = vst [vmem:[#allocation5 + $0x28] sm:$0xff] %v966_v44  ;;  %999 = vst [vmem:[#allocation5 + $0x30] sm:$0xff] %v967_v20  ;;  %v979_v8 = vmul.f32 %v949_v41, %v914_v53  ;;  %v980_v7 = vmul.f32 %v949_v41, %v915_v48  ;;  %v981_v21 = vmul.f32 %v949_v41, %v916_v18 }
 0x122   :  { %1000 = vst [vmem:[#allocation5 + $0x38] sm:$0xff] %v968_v23  ;;  %1001 = vst [vmem:[#allocation5 + $0x40] sm:$0xff] %v969_v29  ;;  %v982_v6 = vmul.f32 %v949_v41, %v917_v25  ;;  %v983_v50 = vmul.f32 %v949_v41, %v918_v35  ;;  %v984_v5 = vmul.f32 %v949_v41, %v919_v13 }
 0x123   :  { %1002 = vst [vmem:[#allocation5 + $0x48] sm:$0xff] %v970_v57  ;;  %1003 = vst [vmem:[#allocation5 + $0x50] sm:$0xff] %v971_v34  ;;  %v985_v58 = vmul.f32 %v956_v22, %v920_v2  ;;  %v986_v1 = vmul.f32 %v956_v22, %v921_v52  ;;  %v987_v15 = vmul.f32 %v956_v22, %v922_v63 }
 0x124   :  { %1004 = vst [vmem:[#allocation5 + $0x58] sm:$0xff] %v972_v38  ;;  %1005 = vst [vmem:[#allocation5 + $0x60] sm:$0xff] %v973_v26  ;;  %v988_v55 = vmul.f32 %v956_v22, %v923_v11  ;;  %v989_v39 = vmul.f32 %v956_v22, %v924_v56  ;;  %v990_v3 = vmul.f32 %v956_v22, %v925_v14 }
 0x125   :  { %1006 = vst [vmem:[#allocation5 + $0x68] sm:$0xff] %v974_v46  ;;  %1007 = vst [vmem:[#allocation5 + $0x70] sm:$0xff] %v975_v49  ;;  %v991_v12 = vmul.f32 %v956_v22, %v926_v62  ;;  %v992_v27 = vmul.f32 %v956_v22, %v927_v60 }
 0x126   :  { %1008 = vst [vmem:[#allocation5 + $0x78] sm:$0xff] %v976_v33  ;;  %1009 = vst [vmem:[#allocation5 + $0x80] sm:$0xff] %v977_v40 }
 0x127   :  { %1010 = vst [vmem:[#allocation5 + $0x88] sm:$0xff] %v978_v31  ;;  %1011 = vst [vmem:[#allocation5 + $0x90] sm:$0xff] %v979_v8 }
 0x128   :  { %1012 = vst [vmem:[#allocation5 + $0x98] sm:$0xff] %v980_v7  ;;  %1013 = vst [vmem:[#allocation5 + $0xa0] sm:$0xff] %v981_v21 }
 0x129   :  { %1014 = vst [vmem:[#allocation5 + $0xa8] sm:$0xff] %v982_v6  ;;  %1015 = vst [vmem:[#allocation5 + $0xb0] sm:$0xff] %v983_v50 }
 0x12a   :  { %1016 = vst [vmem:[#allocation5 + $0xb8] sm:$0xff] %v984_v5  ;;  %1017 = vst [vmem:[#allocation5 + $0xc0] sm:$0xff] %v985_v58 }
 0x12b   :  { %1018 = vst [vmem:[#allocation5 + $0xc8] sm:$0xff] %v986_v1  ;;  %1019 = vst [vmem:[#allocation5 + $0xd0] sm:$0xff] %v987_v15 }
 0x12c   :  { %1020 = vst [vmem:[#allocation5 + $0xd8] sm:$0xff] %v988_v55  ;;  %1021 = vst [vmem:[#allocation5 + $0xe0] sm:$0xff] %v989_v39 }
 0x12d   :  { %1022 = vst [vmem:[#allocation5 + $0xe8] sm:$0xff] %v990_v3  ;;  %1023 = vst [vmem:[#allocation5 + $0xf0] sm:$0xff] %v991_v12 }
 0x12e   :  { %1024 = vst [vmem:[#allocation5 + $0xf8] sm:$0xff] %v992_v27 }
 0x12f   :  { %1029 = vsyncadd [#allocation4], 3072  ;;  %s1109_s0 = smov [#allocation5]  }
 0x130   :  { %s1030_s21 = sshll.u32 %s1109_s0, 4  ;;  %s1031_s21 = int_to_ptr.vmem [resolvable:$true] %s1030_s21 }
 0x131   :  { %s1075_s22 = scalar_lea.vmem %s1031_s21, 1024  ;;  %s1079_s23 = scalar_lea.vmem %s1031_s21, 4096 }
 0x132   :  { %p1076_p8 = scmp.ne.s32.totalorder %s1031_s21, %s1075_s22  ;;  %p1080_p9 = scmp.lt.s32.totalorder %s1031_s21, %s1031_s21 }
 0x133   :  { %p1081_p10 = scmp.lt.s32.totalorder %s1079_s23, %s1075_s22 }
 0x135   :  { %p1082_p11 = por %p1081_p10, %p1080_p9 }
 0x137   :  { %p1083_p12 = pnand %p1082_p11, %p1076_p8 }
 0x139   :  { %1086 = shalt.err (!%p1083_p12)
}
 0x13a   :  { %s1087_s26 = scalar_lea.hbm %s1504_s1, 1024 }
 0x13b   :  { %p1088_p13 = scmp.ne.s32.totalorder %s1504_s1, %s1087_s26  ;;  %p1091_p0 = scmp.lt.u32.totalorder %s1087_s26, %s1504_s1 }
 0x13d   :  { %p1093_p1 = pnand %p1091_p0, %p1088_p13 }
 0x13f   :  { %1096 = shalt.err (!%p1093_p1)
}
 0x140   :  { %1036 = dma.vmem_to_hbm [thread:$0]  %s1031_s21, 1024, %s1504_s1, [#allocation4], %s1102_s17, %s1102_s17, %s1103_s18  }
 0x141   :  { %1099 = dma.done.wait [#allocation4], 4096  }
 0x142   :  { %1100 = vsyncadd [#allocation4], 4294963200 }
 0x143   :  { %1040 = vsyncpa [#allocation3], 1 }
 0x144   :  { %1041 = vsyncpa [#allocation4], 1 }

</bundles_post_ra>
